<compile_context>
chip_gen: v5e
topology: v5e:2x2
jax: 0.10.0
libtpu: 0.0.40
codegen_flags: <defaults>
</compile_context>

<pallas_src>
import math

import jax
import jax.numpy as jnp
from jax.experimental import pallas as pl
from jax.experimental.pallas import tpu as pltpu


def _intensity_kernel(noise_ref, x_ref, o_ref):
    # noise_ref: (TB, 1) f32 per-row noise factor (VMEM).
    # x_ref/o_ref: (TB, TN) data tile (VMEM).
    # Broadcast multiply along the lane axis; explicit cast keeps bf16/int8 safe.
    o_ref[...] = (x_ref[...] * noise_ref[...]).astype(o_ref.dtype)


def _sublane_multiple(itemsize):
    # Sub-32-bit dtypes pack along sublanes: f32 -> 8, bf16 -> 16, int8/fp8 -> 32.
    return max(8, 32 // itemsize)


def _choose_chunks(B, N, sm, max_chunks=64):
    """Split each batch row into `chunks` sub-rows so (B*chunks) packs full sublanes."""
    if B % sm == 0:
        return 1
    need = sm // math.gcd(B, sm)  # smallest c with (B*c) % sm == 0
    c = need
    while c <= max_chunks:
        if N % c == 0 and (N // c) % 128 == 0 and (N // c) >= 128:
            return c
        c += need
    return 1


def _choose_tile(M, N, itemsize, sm, target_bytes):
    """Pick (TB, TN): lane dim 128-aligned (or full), sublane dim dtype-aware,
    tile sized to ~target_bytes so per-grid-step overhead is amortized."""
    # --- Lane tile TN ---
    lane_cap = max(128, (target_bytes // (sm * itemsize)) // 128 * 128)
    if N <= lane_cap:
        TN = N  # whole row (full-dim exception covers N % 128 != 0)
    elif N % 128 == 0:
        TN = lane_cap
        # Prefer an exact divisor of N (no masked tail), but only if it is not
        # much smaller than the target (bounded search: >= lane_cap/2).
        for cand in range(lane_cap, lane_cap // 2 - 1, -128):
            if cand >= 128 and N % cand == 0:
                TN = cand
                break
    else:
        # Large unaligned N: keep a 128-aligned tile; the partial tail block is
        # masked by Pallas.  Never take the whole unaligned row (VMEM blow-up).
        TN = lane_cap

    # --- Sublane tile TB ---
    if M <= sm:
        TB = M  # full-dim exception
    else:
        want = max(sm, target_bytes // (TN * itemsize))
        TB = max(sm, (min(want, M) // sm) * sm)
    return TB, TN


def intensity(x, r, scale, *, target_bytes=4 << 20):
    """x: (B, C, H, W); r: (B,) ~ N(0,1). Returns x * (1 + scale*clip(r, -2, 2))."""
    B, C, H, W = x.shape
    N = C * H * W
    itemsize = jnp.dtype(x.dtype).itemsize
    sm = _sublane_multiple(itemsize)

    # Glue math (cheap, O(B)): clamp + affine done once in the wrapper so the
    # kernel hot loop is a single broadcast multiply.
    noise = 1.0 + float(scale) * jnp.clip(r.reshape(B).astype(jnp.float32), -2.0, 2.0)

    # Re-chunk rows when B doesn't fill the sublane pack (e.g. B=2): each batch
    # row becomes `chunks` 128-aligned sub-rows, noise repeated per sub-row.
    chunks = _choose_chunks(B, N, sm)
    M, N2 = B * chunks, N // chunks
    x2 = x.reshape(M, N2)
    if chunks > 1:
        noise2 = jnp.repeat(noise, chunks).reshape(M, 1)
    else:
        noise2 = noise.reshape(M, 1)

    TB, TN = _choose_tile(M, N2, itemsize, sm, target_bytes)
    grid = (pl.cdiv(M, TB), pl.cdiv(N2, TN))

    out2 = pl.pallas_call(
        _intensity_kernel,
        out_shape=jax.ShapeDtypeStruct((M, N2), x.dtype),
        grid=grid,
        in_specs=[
            pl.BlockSpec((TB, 1), lambda i, j: (i, 0)),    # per-row noise
            pl.BlockSpec((TB, TN), lambda i, j: (i, j)),   # data tile
        ],
        out_specs=pl.BlockSpec((TB, TN), lambda i, j: (i, j)),
        compiler_params=pltpu.CompilerParams(
            dimension_semantics=("parallel", "parallel"),
            # 2x double-buffered (in+out) ~4 MiB tiles = ~16 MiB; raise the scoped
            # limit so v5e (16 MiB default) also fits comfortably.
            vmem_limit_bytes=32 << 20),
    )(noise2, x2)

    return out2.reshape(B, C, H, W)


if __name__ == "__main__":
    key = jax.random.PRNGKey(0)
    kx, kr = jax.random.split(key)

    B, C, H, W = 2, 4, 16, 16
    scale = 0.5

    x = jax.random.normal(kx, (B, C, H, W), dtype=jnp.float32)
    # Per-batch randn that torch.randn((B,1,1,1)) would produce; generated
    # deterministically in-script (glue, not part of the hot path).
    # TODO(synk): in-module RNG (torch.randn) is sampled in the wrapper, not in-kernel.
    r = jax.random.normal(kr, (B,), dtype=jnp.float32)

    out = intensity(x, r, scale)
    out = jax.block_until_ready(out)

    # Pure-JAX reference.
    noise_ref = 1.0 + scale * jnp.clip(r, -2.0, 2.0)
    ref = x * noise_ref[:, None, None, None]
    assert out.shape == x.shape and out.dtype == x.dtype
    assert jnp.allclose(out, ref, atol=1e-6, rtol=1e-6)

    print("KERNEL_OK")
</pallas_src>

<mosaic_0001>
module attributes {stable_mosaic.version = 11 : i64} {
  func.func @_intensity_kernel(%arg0: i32, %arg1: i32, %arg2: memref<8x1xf32, #tpu.memory_space<vmem>>, %arg3: memref<8x256xf32, #tpu.memory_space<vmem>>, %arg4: memref<8x256xf32, #tpu.memory_space<vmem>>) attributes {dimension_semantics = [#tpu.dimension_semantics<parallel>, #tpu.dimension_semantics<parallel>], iteration_bounds = array<i64: 1, 1>, scalar_prefetch = 0 : i64, scratch_operands = 0 : i64, tpu.core_type = #tpu.core_type<tc>, window_params = [{transform_indices = @transform_0, window_bounds = array<i64: 8, 1>}, {transform_indices = @transform_1, window_bounds = array<i64: 8, 256>}, {transform_indices = @transform_2, window_bounds = array<i64: 8, 256>}]} {
    %c0 = arith.constant 0 : index
    %c0_0 = arith.constant 0 : index
    %0 = vector.load %arg3[%c0, %c0_0] : memref<8x256xf32, #tpu.memory_space<vmem>>, vector<8x256xf32>
    %c0_1 = arith.constant 0 : index
    %c0_2 = arith.constant 0 : index
    %1 = vector.load %arg2[%c0_1, %c0_2] : memref<8x1xf32, #tpu.memory_space<vmem>>, vector<8x1xf32>
    %2 = vector.broadcast %1 : vector<8x1xf32> to vector<8x256xf32>
    %3 = arith.mulf %0, %2 : vector<8x256xf32>
    %c0_3 = arith.constant 0 : index
    %c0_4 = arith.constant 0 : index
    %4 = vector.load %arg4[%c0_3, %c0_4] : memref<8x256xf32, #tpu.memory_space<vmem>>, vector<8x256xf32>
    tpu.vector_store %arg4[%c0_3, %c0_4], %3 {strides = array<i32>} : memref<8x256xf32, #tpu.memory_space<vmem>>, vector<8x256xf32>,
    return
  }
  func.func @transform_0(%arg0: i32, %arg1: i32) -> (i32, i32) {
    %c0_i32 = arith.constant 0 : i32
    %c0_i32_0 = arith.constant 0 : i32
    return %arg0, %c0_i32 : i32, i32
  }
  func.func @transform_1(%arg0: i32, %arg1: i32) -> (i32, i32) {
    %c0_i32 = arith.constant 0 : i32
    return %arg0, %arg1 : i32, i32
  }
  func.func @transform_2(%arg0: i32, %arg1: i32) -> (i32, i32) {
    %c0_i32 = arith.constant 0 : i32
    return %arg0, %arg1 : i32, i32
  }
}

</mosaic_0001>

<bundles_post_ra>
// kernel: tpu_custom_call.1
= control target key start
LH: loop header
LB: loop body
LE: loop exit
PB: predicated region body
PF: predicated region fallthrough
CT: control target
= control target key end

     0   :  { %7 = vsyncpa [#allocation3], 0  ;;  %s138_s0 = inlined_call_operand.vmem [shape: f32[8,1], index: 0, kind: input, shape index: {}]   ;;  %s139_s1 = inlined_call_operand.hbm [shape: f32[8,256], index: 1, kind: input, shape index: {}]   ;;  %s140_s2 = inlined_call_operand.hbm [shape: f32[8,256], index: 2, kind: output, shape index: {}]  }
   0x1   :  { %8 = vsyncpa [#allocation4], 0  ;;  %s16_s11 = sshll.u32 %s139_s1, 4  ;;  %s111_s12 = smov [#allocation2]   ;;  %s17_s11 = int_to_ptr.hbm [resolvable:$true] %s16_s11 }
   0x2   :  { %s18_s13 = sshll.u32 %s111_s12, 4  ;;  %s19_s13 = int_to_ptr.vmem [resolvable:$true] %s18_s13 }
   0x3   :  { %21 = dma.hbm_to_vmem [thread:$0]  %s17_s11, 256, %s19_s13, [#allocation3]  }
   0x4   :  { %107 = dma.done.wait [#allocation3], 256  }
   0x5   :  { %108 = vsyncadd [#allocation3], 4294967040  ;;  %v112_v0 = vmov 0   ;;  %v28_v1 = vld [vmem:[%s138_s0] sm:$0xff]  ;;  %v27_v3 = vld [vmem:[#allocation2 + $0x8] sm:$0xff]  ;;  %s113_s16 = smov [#allocation5]  }
   0x6   :  { %58 = vset.pattern.permute.xlu0 %v112_v0  ;;  %v26_v2 = vld [vmem:[#allocation2] sm:$0xff]  ;;  %s43_s17 = sshll.u32 %s113_s16, 4  ;;  %s45_s19 = sshll.u32 %s140_s2, 4  ;;  %s44_s17 = int_to_ptr.vmem [resolvable:$true] %s43_s17  ;;  %s46_s19 = int_to_ptr.hbm [resolvable:$true] %s45_s19 }
   0x7   :  { %31 = vperm.xlu0 %58, %v28_v1  }
  0x79   :  { %v32_v4 = vpop.permute.xlu0 %31 }
  0x7a   :  { %v34_v5 = vmul.f32 %v32_v4, %v26_v2  ;;  %v35_v6 = vmul.f32 %v32_v4, %v27_v3 }
  0x7c   :  { %36 = vst [vmem:[#allocation5] sm:$0xff] %v34_v5 }
  0x7d   :  { %37 = vst [vmem:[#allocation5 + $0x8] sm:$0xff] %v35_v6 }
  0x7e   :  { %48 = dma.vmem_to_hbm [thread:$0]  %s44_s17, 256, %s46_s19, [#allocation4]  }
  0x7f   :  { %109 = dma.done.wait [#allocation4], 256  }
  0x80   :  { %110 = vsyncadd [#allocation4], 4294967040 }
  0x81   :  { %53 = vsyncpa [#allocation3], 1 }
  0x82   :  { %54 = vsyncpa [#allocation4], 1 }

</bundles_post_ra>
